<compile_context>
chip_gen: v7x
topology: tpu7x:2x2x1
jax: 0.10.0
libtpu: 0.0.40
codegen_flags: <defaults>
</compile_context>

<pallas_src>
import jax
import jax.numpy as jnp
from jax.experimental import pallas as pl
from jax.experimental.pallas import tpu as pltpu


def _round_up(x: int, m: int) -> int:
    return ((x + m - 1) // m) * m


def _chip_config():
    """Per-generation sizing: TensorCore count, MXU row alignment, VMEM budget."""
    kind = ""
    try:
        kind = jax.devices()[0].device_kind.lower()
    except Exception:
        pass
    num_tc = 2 if "v7" in kind else 1            # v7x: 2 TensorCores / chip
    mxu_align = 128 if "v5" in kind else 256     # MXU pass width: v5e=128, v6e/v7x=256
    try:
        vmem_cap = int(pltpu.get_tpu_info().vmem_capacity_bytes)
    except Exception:
        vmem_cap = 64 * 1024 * 1024              # conservative fallback (v7x per-core)
    vmem_budget = (vmem_cap * 3) // 4            # ~96 MiB on v5e/v6e, ~48 MiB on v7x
    return num_tc, mxu_align, vmem_budget


def _attention_kernel(x_ref, w_ref, b_ref, out_ref, acc_ref):
    # x_ref:   (tile_n, tile_k)
    # w_ref:   (tile_k, 2*out_pad)  fused [Wq^T | Wv^T], zero-padded K rows / lanes
    # b_ref:   (1, 2*out_pad)       fused [bq | bv], f32
    # out_ref: (tile_n, out_dim)
    # acc_ref: (tile_n, 2*out_pad)  f32 accumulator, persists across the K axis
    k = pl.program_id(1)

    @pl.when(k == 0)
    def _():
        acc_ref[...] = jnp.zeros_like(acc_ref)

    # Single fused GEMM (per K block), f32 accumulation on the MXU.
    acc_ref[...] += jnp.dot(x_ref[...], w_ref[...],
                            preferred_element_type=jnp.float32)

    @pl.when(k == pl.num_programs(1) - 1)
    def _():
        out_pad = acc_ref.shape[-1] // 2
        out_dim = out_ref.shape[-1]
        fused = acc_ref[...] + b_ref[...]
        qk = jax.nn.sigmoid(fused[:, :out_pad])      # EUP
        v = fused[:, out_pad:]
        out_ref[...] = (qk[:, :out_dim] * v[:, :out_dim]).astype(out_ref.dtype)


def prepare_attention_params(wq, bq, wv, bv, *, bf16_matmul=False, w_dtype=None):
    """Build the fused / padded weight slab ONCE per parameter set.

    wq, wv: (out_dim, dim) in PyTorch nn.Linear layout; bq, bv: (out_dim,).
    Hoisting this out of the per-call path avoids an extra HBM pass over the
    weights on every forward (weight-stationary inference).
    """
    out_dim, dim = wq.shape
    if w_dtype is None:
        w_dtype = jnp.bfloat16 if bf16_matmul else wq.dtype

    num_tc, mxu_align, vmem_budget = _chip_config()

    out_pad = _round_up(out_dim, 128)          # lane-dense GEMM output width
    wide = 2 * out_pad
    w_itemsize = jnp.dtype(w_dtype).itemsize

    # K (contraction) planning: keep the whole slab resident (single-buffered)
    # if it fits in ~40% of the budget; otherwise K-tile it (multiple of 128),
    # double-buffered, with an f32 accumulator in the kernel.
    dim_plan = _round_up(dim, 128) if dim > 128 else dim
    w_budget = int(vmem_budget * 0.4)
    if dim_plan * wide * w_itemsize <= w_budget:
        tile_k, nk = dim_plan, 1
    else:
        tile_k = max(128, ((w_budget // (2 * wide * w_itemsize)) // 128) * 128)
        tile_k = min(tile_k, dim_plan)
        nk = pl.cdiv(dim_plan, tile_k)
    dim_pad = tile_k * nk                      # every K block is exact (zero-padded)

    wq_t = jnp.zeros((dim_pad, out_pad), w_dtype).at[:dim, :out_dim].set(
        wq.T.astype(w_dtype))
    wv_t = jnp.zeros((dim_pad, out_pad), w_dtype).at[:dim, :out_dim].set(
        wv.T.astype(w_dtype))
    w_fused = jnp.concatenate([wq_t, wv_t], axis=1)            # (dim_pad, 2*out_pad)

    b_fused = jnp.zeros((1, wide), jnp.float32)
    b_fused = b_fused.at[0, :out_dim].set(bq.astype(jnp.float32))
    b_fused = b_fused.at[0, out_pad:out_pad + out_dim].set(bv.astype(jnp.float32))

    return dict(w_fused=w_fused, b_fused=b_fused, w_dtype=w_dtype,
                dim=dim, dim_pad=dim_pad, out_dim=out_dim, out_pad=out_pad,
                tile_k=tile_k, nk=nk,
                num_tc=num_tc, mxu_align=mxu_align, vmem_budget=vmem_budget)


def attention_forward(x, params, *, tile_n=None):
    """x: (N, dim). Returns (N, out_dim) in x.dtype."""
    N, dim = x.shape
    assert dim == params["dim"], "x feature dim does not match prepared params"

    out_dim, out_pad = params["out_dim"], params["out_pad"]
    dim_pad, tile_k, nk = params["dim_pad"], params["tile_k"], params["nk"]
    num_tc, mxu_align = params["num_tc"], params["mxu_align"]
    vmem_budget = params["vmem_budget"]
    wide = 2 * out_pad
    out_dtype = x.dtype

    # MXU input dtype (bf16 fast path if requested at prepare time).
    x_mm = x.astype(params["w_dtype"]) if x.dtype != params["w_dtype"] else x
    # Pad the contraction dim so every K block is exact / lane-dense.
    if dim_pad != dim:
        x_mm = jnp.zeros((N, dim_pad), x_mm.dtype).at[:, :dim].set(x_mm)

    x_itemsize = jnp.dtype(x_mm.dtype).itemsize
    out_itemsize = jnp.dtype(out_dtype).itemsize
    w_itemsize = jnp.dtype(params["w_dtype"]).itemsize
    w_resident = (dim_pad * wide * w_itemsize if nk == 1        # single-buffered slab
                  else 2 * tile_k * wide * w_itemsize)          # double-buffered stream

    def step_bytes(t):
        # Everything resident in VMEM per grid step.
        return (2 * t * tile_k * x_itemsize          # double-buffered x tile
                + 2 * t * out_dim * out_itemsize     # double-buffered out tile
                + t * wide * 4                       # f32 accumulator scratch
                + 2 * t * wide * 4                   # f32 epilogue temporaries
                + wide * 4                           # bias
                + w_resident)

    if tile_n is None:
        row_align = mxu_align if N >= mxu_align else 8
        tile_n = min(_round_up(N, row_align), 4096)
        while tile_n > row_align and step_bytes(tile_n) > vmem_budget:
            tile_n = max(row_align, _round_up(tile_n // 2, row_align))
        while tile_n > 8 and step_bytes(tile_n) > vmem_budget:
            tile_n = max(8, _round_up(tile_n // 2, 8))
        # Only split a VMEM-fitting workload across row tiles when there are
        # >= 2 TensorCores (v7x) to shard the "parallel" axis; on 1-TC chips a
        # 2-way split just adds per-step overhead.
        if num_tc >= 2 and tile_n >= N and N >= 2 * num_tc * mxu_align:
            tile_n = max(mxu_align, _round_up(pl.cdiv(N, 2 * num_tc), mxu_align))
    tile_n = max(8, _round_up(int(tile_n), 8))

    grid = (pl.cdiv(N, tile_n), nk)

    w_spec = (pl.BlockSpec((tile_k, wide), lambda i, k: (0, 0),
                           pipeline_mode=pl.Buffered(1))        # constant, resident
              if nk == 1 else
              pl.BlockSpec((tile_k, wide), lambda i, k: (k, 0)))  # streamed over K

    flops = 2 * N * dim_pad * wide + 3 * N * out_pad
    bytes_accessed = (N * dim_pad * x_itemsize
                      + dim_pad * wide * w_itemsize
                      + wide * 4
                      + N * out_dim * out_itemsize)

    out = pl.pallas_call(
        _attention_kernel,
        out_shape=jax.ShapeDtypeStruct((N, out_dim), out_dtype),
        grid_spec=pltpu.PrefetchScalarGridSpec(
            num_scalar_prefetch=0,
            grid=grid,
            in_specs=[
                pl.BlockSpec((tile_n, tile_k), lambda i, k: (i, k)),
                w_spec,
                pl.BlockSpec((1, wide), lambda i, k: (0, 0),
                             pipeline_mode=pl.Buffered(1)),
            ],
            out_specs=pl.BlockSpec((tile_n, out_dim), lambda i, k: (i, 0)),
            scratch_shapes=[pltpu.VMEM((tile_n, wide), jnp.float32)],
        ),
        compiler_params=pltpu.CompilerParams(
            dimension_semantics=("parallel", "arbitrary"),
            vmem_limit_bytes=vmem_budget,
        ),
        cost_estimate=pl.CostEstimate(
            flops=flops,
            transcendentals=N * out_pad,
            bytes_accessed=bytes_accessed,
        ),
    )(x_mm, params["w_fused"], params["b_fused"])
    return out


def attention(x, wq, bq, wv, bv):
    """One-off convenience wrapper (prefer prepare_attention_params + forward)."""
    return attention_forward(x, prepare_attention_params(wq, bq, wv, bv))


if __name__ == "__main__":
    # Small shapes consistent with nn.Linear(dim, out_dim): N=8, dim=32, out_dim=32.
    N, dim, out_dim = 8, 32, 32

    key = jax.random.PRNGKey(0)
    kx, kwq, kbq, kwv, kbv = jax.random.split(key, 5)

    x = jax.random.normal(kx, (N, dim), dtype=jnp.float32)
    # PyTorch-shaped parameters (Linear weight: (out_dim, dim)).
    wq = jax.random.normal(kwq, (out_dim, dim), dtype=jnp.float32) * 0.1
    bq = jax.random.normal(kbq, (out_dim,), dtype=jnp.float32) * 0.1
    wv = jax.random.normal(kwv, (out_dim, dim), dtype=jnp.float32) * 0.1
    bv = jax.random.normal(kbv, (out_dim,), dtype=jnp.float32) * 0.1

    # Weight-stationary: fused / padded slab built once, reused across calls.
    params = prepare_attention_params(wq, bq, wv, bv)
    out = attention_forward(x, params)
    out = jax.block_until_ready(out)

    # Reference check in plain JAX (same math as the PyTorch forward).
    qk_ref = jax.nn.sigmoid(x @ wq.T + bq)
    v_ref = x @ wv.T + bv
    ref = qk_ref * v_ref
    assert out.shape == ref.shape, "shape mismatch vs reference"
    assert jnp.allclose(out, ref, atol=1e-5, rtol=1e-5), "mismatch vs reference"

    # Note: at these demo shapes the kernel is launch-overhead dominated;
    # benchmark at realistic N/dim/out_dim to see the fused-GEMM / tiling wins.
    print("KERNEL_OK")
</pallas_src>

<mosaic_0001>
module attributes {stable_mosaic.version = 11 : i64} {
  func.func @_attention_kernel(%arg0: i32, %arg1: i32, %arg2: memref<8x32xf32, #tpu.memory_space<vmem>>, %arg3: memref<32x256xf32, #tpu.memory_space<vmem>>, %arg4: memref<1x256xf32, #tpu.memory_space<vmem>>, %arg5: memref<8x32xf32, #tpu.memory_space<vmem>>, %arg6: memref<8x256xf32, #tpu.memory_space<vmem>>) attributes {dimension_semantics = [#tpu.dimension_semantics<parallel>, #tpu.dimension_semantics<arbitrary>], iteration_bounds = array<i64: 1, 1>, scalar_prefetch = 0 : i64, scratch_operands = 1 : i64, tpu.core_type = #tpu.core_type<tc>, window_params = [{transform_indices = @transform_0, window_bounds = array<i64: 8, 32>}, {pipeline_mode = #tpu.pipeline_mode<synchronous>, transform_indices = @transform_1, window_bounds = array<i64: 32, 256>}, {pipeline_mode = #tpu.pipeline_mode<synchronous>, transform_indices = @transform_2, window_bounds = array<i64: 1, 256>}, {transform_indices = @transform_3, window_bounds = array<i64: 8, 32>}]} {
    %c0_i32 = arith.constant 0 : i32
    %0 = arith.cmpi eq, %arg1, %c0_i32 : i32
    %1 = arith.extui %0 : i1 to i32
    %c0_i32_0 = arith.constant 0 : i32
    %2 = arith.cmpi ne, %1, %c0_i32_0 : i32
    scf.if %2 {
      %cst_10 = arith.constant 0.000000e+00 : f32
      %12 = vector.broadcast %cst_10 : f32 to vector<8x256xf32>
      %c0_11 = arith.constant 0 : index
      %c0_12 = arith.constant 0 : index
      %13 = vector.load %arg6[%c0_11, %c0_12] : memref<8x256xf32, #tpu.memory_space<vmem>>, vector<8x256xf32>
      tpu.vector_store %arg6[%c0_11, %c0_12], %12 {strides = array<i32>} : memref<8x256xf32, #tpu.memory_space<vmem>>, vector<8x256xf32>,
    } else {
    }
    %c0 = arith.constant 0 : index
    %c0_1 = arith.constant 0 : index
    %3 = vector.load %arg6[%c0, %c0_1] : memref<8x256xf32, #tpu.memory_space<vmem>>, vector<8x256xf32>
    %c0_2 = arith.constant 0 : index
    %c0_3 = arith.constant 0 : index
    %4 = vector.load %arg2[%c0_2, %c0_3] : memref<8x32xf32, #tpu.memory_space<vmem>>, vector<8x32xf32>
    %c0_4 = arith.constant 0 : index
    %c0_5 = arith.constant 0 : index
    %5 = vector.load %arg3[%c0_4, %c0_5] : memref<32x256xf32, #tpu.memory_space<vmem>>, vector<32x256xf32>
    %cst = arith.constant dense<0.000000e+00> : vector<8x256xf32>
    %6 = tpu.matmul %4, %5, %cst {dimension_numbers = #tpu.dot_dimension_numbers<[1], [0], [0], [1], [0, 0, 1, 1], [], []>} : vector<8x32xf32>, vector<32x256xf32>, vector<8x256xf32> -> vector<8x256xf32>
    %7 = arith.addf %3, %6 : vector<8x256xf32>
    %c0_6 = arith.constant 0 : index
    %c0_7 = arith.constant 0 : index
    %8 = vector.load %arg6[%c0_6, %c0_7] : memref<8x256xf32, #tpu.memory_space<vmem>>, vector<8x256xf32>
    tpu.vector_store %arg6[%c0_6, %c0_7], %7 {strides = array<i32>} : memref<8x256xf32, #tpu.memory_space<vmem>>, vector<8x256xf32>,
    %c0_i32_8 = arith.constant 0 : i32
    %9 = arith.cmpi eq, %arg1, %c0_i32_8 : i32
    %10 = arith.extui %9 : i1 to i32
    %c0_i32_9 = arith.constant 0 : i32
    %11 = arith.cmpi ne, %10, %c0_i32_9 : i32
    scf.if %11 {
      %c0_10 = arith.constant 0 : index
      %c0_11 = arith.constant 0 : index
      %12 = vector.load %arg6[%c0_10, %c0_11] : memref<8x256xf32, #tpu.memory_space<vmem>>, vector<8x256xf32>
      %c0_12 = arith.constant 0 : index
      %c0_13 = arith.constant 0 : index
      %13 = vector.load %arg4[%c0_12, %c0_13] : memref<1x256xf32, #tpu.memory_space<vmem>>, vector<1x256xf32>
      %14 = vector.broadcast %13 : vector<1x256xf32> to vector<8x256xf32>
      %15 = arith.addf %12, %14 : vector<8x256xf32>
      %16 = vector.extract_strided_slice %15 {offsets = [0, 0], sizes = [8, 128], strides = [1, 1]} : vector<8x256xf32> to vector<8x128xf32>
      %17 = arith.negf %16 : vector<8x128xf32>
      %18 = math.exp %17 : vector<8x128xf32>
      %cst_14 = arith.constant 1.000000e+00 : f32
      %19 = vector.broadcast %cst_14 : f32 to vector<8x128xf32>
      %20 = arith.addf %19, %18 : vector<8x128xf32>
      %21 = arith.divf %19, %20 : vector<8x128xf32>
      %22 = vector.extract_strided_slice %15 {offsets = [0, 128], sizes = [8, 128], strides = [1, 1]} : vector<8x256xf32> to vector<8x128xf32>
      %23 = vector.extract_strided_slice %21 {offsets = [0, 0], sizes = [8, 32], strides = [1, 1]} : vector<8x128xf32> to vector<8x32xf32>
      %24 = vector.extract_strided_slice %22 {offsets = [0, 0], sizes = [8, 32], strides = [1, 1]} : vector<8x128xf32> to vector<8x32xf32>
      %25 = arith.mulf %23, %24 : vector<8x32xf32>
      %c0_15 = arith.constant 0 : index
      %c0_16 = arith.constant 0 : index
      %26 = vector.load %arg5[%c0_15, %c0_16] : memref<8x32xf32, #tpu.memory_space<vmem>>, vector<8x32xf32>
      tpu.vector_store %arg5[%c0_15, %c0_16], %25 {strides = array<i32>} : memref<8x32xf32, #tpu.memory_space<vmem>>, vector<8x32xf32>,
    } else {
    }
    return
  }
  func.func @transform_0(%arg0: i32, %arg1: i32) -> (i32, i32) {
    %c0_i32 = arith.constant 0 : i32
    return %arg0, %arg1 : i32, i32
  }
  func.func @transform_1(%arg0: i32, %arg1: i32) -> (i32, i32) {
    %c0_i32 = arith.constant 0 : i32
    %c0_i32_0 = arith.constant 0 : i32
    %c0_i32_1 = arith.constant 0 : i32
    return %c0_i32, %c0_i32_0 : i32, i32
  }
  func.func @transform_2(%arg0: i32, %arg1: i32) -> (i32, i32) {
    %c0_i32 = arith.constant 0 : i32
    %c0_i32_0 = arith.constant 0 : i32
    %c0_i32_1 = arith.constant 0 : i32
    return %c0_i32, %c0_i32_0 : i32, i32
  }
  func.func @transform_3(%arg0: i32, %arg1: i32) -> (i32, i32) {
    %c0_i32 = arith.constant 0 : i32
    %c0_i32_0 = arith.constant 0 : i32
    return %arg0, %c0_i32 : i32, i32
  }
}

</mosaic_0001>

<bundles_post_ra>
// kernel: tpu_custom_call.1
= control target key start
LH: loop header
LB: loop body
LE: loop exit
PB: predicated region body
PF: predicated region fallthrough
CT: control target
= control target key end

     0   :  { %8 = vsyncpa [#allocation4], 0  ;;  %s346_s0 = inlined_call_operand.hbm [shape: f32[8,32], index: 0, kind: input, shape index: {}]   ;;  %s347_s1 = inlined_call_operand.hbm [shape: f32[32,256], index: 1, kind: input, shape index: {}]   ;;  %s348_s2 = inlined_call_operand.vmem [shape: f32[1,256], index: 2, kind: input, shape index: {}]   ;;  %s349_s3 = inlined_call_operand.hbm [shape: f32[8,32], index: 3, kind: output, shape index: {}]  }
   0x1   :  { %9 = vsyncpa [#allocation7], 0 }
   0x2   :  { %10 = vsyncpa [#allocation5], 0  ;;  %s272_s12 = smov [#allocation3]   ;;  %s273_s14 = smov [#allocation6]  }
   0x3   :  { %s17_s13 = sshll.u32 %s272_s12, 4  ;;  %s26_s15 = sshll.u32 %s273_s14, 4  ;;  %s18_s13 = int_to_ptr.vmem [resolvable:$true] %s17_s13  ;;  %s298_s15 = int_to_ptr.vmem [resolvable:$true] %s26_s15 }
   0x4   :  { %s200_s18 = scalar_lea.hbm %s346_s0, 128 }
   0x5   :  { %p201_p0 = scmp.ne.s32.totalorder %s346_s0, %s200_s18  ;;  %p204_p1 = scmp.lt.u32.totalorder %s200_s18, %s346_s0 }
   0x7   :  { %p206_p2 = pnand %p204_p1, %p201_p0 }
   0x9   :  { %209 = shalt.err (!%p206_p2)
}
   0xa   :  { %s210_s23 = scalar_lea.vmem %s18_s13, 128  ;;  %p215_p4 = scmp.lt.s32.totalorder %s18_s13, %s18_s13 }
   0xb   :  { %p211_p3 = scmp.ne.s32.totalorder %s18_s13, %s210_s23  ;;  %p216_p5 = scmp.lt.s32.totalorder %s210_s23, %s210_s23 }
   0xd   :  { %p217_p6 = por %p216_p5, %p215_p4 }
   0xf   :  { %p218_p7 = pnand %p217_p6, %p211_p3 }
  0x11   :  { %221 = shalt.err (!%p218_p7)
}
  0x12   :  { %20 = dma.hbm_to_vmem [thread:$0]  %s346_s0, 128, %s18_s13, [#allocation4]  }
  0x13   :  { %s222_s28 = scalar_lea.hbm %s347_s1, 1024 }
  0x14   :  { %p223_p8 = scmp.ne.s32.totalorder %s347_s1, %s222_s28  ;;  %p226_p9 = scmp.lt.u32.totalorder %s222_s28, %s347_s1 }
  0x16   :  { %p228_p10 = pnand %p226_p9, %p223_p8 }
  0x18   :  { %231 = shalt.err (!%p228_p10)
}
  0x19   :  { %s232_s6 = scalar_lea.vmem %s298_s15, 1024  ;;  %p237_p12 = scmp.lt.s32.totalorder %s298_s15, %s298_s15 }
  0x1a   :  { %p233_p11 = scmp.ne.s32.totalorder %s298_s15, %s232_s6  ;;  %p238_p13 = scmp.lt.s32.totalorder %s232_s6, %s232_s6 }
  0x1c   :  { %p239_p0 = por %p238_p13, %p237_p12 }
  0x1e   :  { %p240_p1 = pnand %p239_p0, %p233_p11 }
  0x20   :  { %243 = shalt.err (!%p240_p1)
}
  0x21   :  { %s274_s0 = smov 256   ;;  %s275_s7 = smov 16  }
  0x22   :  { %32 = dma.hbm_to_vmem [thread:$0]  %s347_s1, 1024, %s298_s15, [#allocation7], %s274_s0, %s274_s0, %s275_s7  }
  0x23   :  { %266 = dma.done.wait [#allocation4], 128  }
  0x24   :  { %267 = vsyncadd [#allocation4], 4294967168 }
  0x25   :  { %268 = dma.done.wait [#allocation7], 1024  }
  0x26   :  { %269 = vsyncadd [#allocation7], 4294966272  ;;  %v276_v0 = vmov 0.0   ;;  %v51_v1 = vld [vmem:[#allocation6 + $0x8] sm:$0xff]  ;;  %v53_v2 = vld [vmem:[#allocation6 + $0x18] sm:$0xff]  ;;  %vm58_vm0 = vcmask 261120   ;;  %v144_v14 = vlaneseq }
  0x27   :  { %126 = vmatprep.mubr.f32.mxu0 %v276_v0  ;;  %v50_v3 = vld [vmem:[#allocation6] sm:$0xff]  ;;  %v182_v4 = vpack.c.bf16 %v53_v2, %v51_v1  ;;  %v52_v5 = vld [vmem:[#allocation6 + $0x10] sm:$0xff]  ;;  %v55_v6 = vld [vmem:[#allocation6 + $0x28] sm:$0xff]  ;;  %s277_s11 = smov [#allocation8]  }
  0x28   :  { %v57_v7 = vld [vmem:[#allocation6 + $0x38] sm:$0xff]  ;;  %v184_v8 = vpack.c.bf16 %v52_v5, %v50_v3  ;;  %v54_v10 = vld [vmem:[#allocation6 + $0x20] sm:$0xff]  ;;  %v56_v11 = vld [vmem:[#allocation6 + $0x30] sm:$0xff]  ;;  %v145_v15 = vshrl.u32 %v144_v14, 7  ;;  %s170_s12 = sshll.u32 %s277_s11, 4  ;;  %s171_s12 = int_to_ptr.vmem [resolvable:$true] %s170_s12 }
  0x29   :  { %v186_v9 = vpack.c.bf16 %v57_v7, %v55_v6  ;;  %183 = vmatprep.subr.bf16.mxu0 %v182_v4  ;;  %v188_v12 = vpack.c.bf16 %v56_v11, %v54_v10  ;;  %v49_v13 = vld [vmem:[#allocation3] sm:$0xff]  ;;  %p249_p3 = scmp.lt.s32.totalorder %s171_s12, %s171_s12 }
  0x2a   :  { %185 = vmatpush1.bf16.msra.mxu0 %v184_v8  ;;  %v146_v16 = vsub.s32 0, %v145_v15  ;;  %v142_v17 = vld [vmem:[%s348_s2] sm:$0x3]  ;;  %v150_v25 = vsub.s32 1, %v145_v15  ;;  %s244_s2 = scalar_lea.vmem %s171_s12, 128 }
  0x2b   :  { %187 = vmatprep.subr.bf16.mxu0 %v186_v9  ;;  %p245_p2 = scmp.ne.s32.totalorder %s171_s12, %s244_s2  ;;  %p250_p4 = scmp.lt.s32.totalorder %s244_s2, %s244_s2 }
  0x2c   :  { %v147_v18 = vrot.slane %v142_v17, %v146_v16  ;;  %v151_v26 = vrot.slane %v142_v17, %v150_v25 }
  0x2d   :  { %p251_p5 = por %p250_p4, %p249_p3 }
  0x2e   :  { %189 = vmatpush1.bf16.msra.mxu0 %v188_v12 }
  0x2f   :  { %p252_p6 = pnand %p251_p5, %p245_p2 }
  0x31   :  { %180 = vmatmul.mubr.msk.f32.vlgmr.msra.gmra.mrb[0].mxu0 %vm58_vm0, %v49_v13 }
 0x104   :  { %v128_v19 = vpop.f32.mrb[0].mxu0 }
 0x105   :  { %v154_v20 = vadd.f32 %v147_v18, %v128_v19  ;;  %v130_v21 = vpop.f32.mrb[1].mxu0 }
 0x106   :  { %v155_v27 = vadd.f32 %v151_v26, %v130_v21 }
 0x107   :  { %v181_v22 = vmul.f32 -1.442695, %v154_v20 }
 0x109   :  { %196 = vpow2.f32 %v181_v22 }
 0x113   :  { %v197_v23 = vpop.eup %196 }
 0x114   :  { %v159_v24 = vadd.f32 1.0, %v197_v23 }
 0x116   :  { %198 = vrcp.f32 %v159_v24 }
 0x120   :  { %v199_v28 = vpop.eup %198 }
 0x121   :  { %v162_v29 = vmul.f32 %v199_v28, %v155_v27 }
 0x123   :  { %163 = vst.msk [vmem:[#allocation8] sm:$0xff] %vm58_vm0, %v162_v29 }
 0x124   :  { %255 = shalt.err (!%p252_p6)
}
 0x125   :  { %s256_s15 = scalar_lea.hbm %s349_s3, 128 }
 0x126   :  { %p257_p7 = scmp.ne.s32.totalorder %s349_s3, %s256_s15  ;;  %p260_p8 = scmp.lt.u32.totalorder %s256_s15, %s349_s3 }
 0x128   :  { %p262_p9 = pnand %p260_p8, %p257_p7 }
 0x12a   :  { %265 = shalt.err (!%p262_p9)
}
 0x12b   :  { %173 = dma.vmem_to_hbm [thread:$0]  %s171_s12, 128, %s349_s3, [#allocation5]  }
 0x12c   :  { %270 = dma.done.wait [#allocation5], 128  }
 0x12d   :  { %271 = vsyncadd [#allocation5], 4294967168 }
 0x12e   :  { %177 = vsyncpa [#allocation4], 1 }
 0x12f   :  { %178 = vsyncpa [#allocation7], 1 }
 0x130   :  { %179 = vsyncpa [#allocation5], 1 }

</bundles_post_ra>
